<compile_context>
chip_gen: v7x
topology: tpu7x:2x2x1
jax: 0.10.0
libtpu: 0.0.40
codegen_flags: <defaults>
</compile_context>

<pallas_src>
import functools

import jax
import jax.numpy as jnp
import numpy as np
from jax import lax
from jax.experimental import pallas as pl
from jax.experimental.pallas import tpu as pltpu


def _mln_kernel(wt_ref, u_ref, out_ref, *, threshold, steepness, num_layers):
    """Entire temporal recurrence in a single kernel invocation (grid=()).

    wt_ref : (Np, Np) VMEM — W.T (bf16 by default, or f32), fully resident
    u_ref  : (T, Np)  VMEM — scattered + preprocessed sensory input (f32)
    out_ref: (T, Np)  VMEM — activations, time-major / neuron-in-lanes
    """

    def activate(z):
        # Elementwise math stays f32 (v5e has no bf16 VPU/EUP path).
        z = jnp.where(z >= threshold, z, 0.0)
        return jnp.tanh(steepness * z)

    def matvec(x_row):
        # Read the resident weight operand at the dot site: exactly one VMEM
        # copy of W.T, never a register-held (Np,Np) value (would exhaust the
        # 64 vregs and spill).  MXU operands may be bf16; accumulate is f32.
        return jnp.dot(x_row.astype(wt_ref.dtype), wt_ref[...],
                       preferred_element_type=jnp.float32)

    # Layer 0:  x0 = act( W @ scatter(in[:, 0]) )
    x = activate(matvec(u_ref[pl.ds(0, 1), :]))
    out_ref[pl.ds(0, 1), :] = x.astype(out_ref.dtype)

    # Layers 1..T-1: strictly sequential recurrence (do NOT parallelize the
    # time axis).  Fully unrolled only while T is small; each step serializes
    # on the MXU result anyway, so deeper unroll is pure code bloat.
    def body(t, x_prev):
        z = matvec(x_prev) + u_ref[pl.ds(t, 1), :]
        x_t = activate(z)
        out_ref[pl.ds(t, 1), :] = x_t.astype(out_ref.dtype)
        return x_t

    unroll = True if num_layers <= 16 else 8
    lax.fori_loop(1, num_layers, body, x, unroll=unroll)


def prepare_weights(all_weights, weights_dtype=jnp.bfloat16):
    """Pad/transpose/cast the connectome once (hoist out of repeated calls).

    Returns (wt, N): wt is (Np, Np) = padded W.T in `weights_dtype`, Np is N
    rounded up to a lane multiple of 128.  Padded rows/cols are zero, so
    padded neurons stay exactly 0 and never leak into real neurons.
    """
    all_weights = jnp.asarray(all_weights, jnp.float32)
    N = all_weights.shape[0]
    Np = max(128, ((N + 127) // 128) * 128)
    wt = jnp.zeros((Np, Np), jnp.float32).at[:N, :N].set(all_weights.T)
    return wt.astype(weights_dtype), N


def multilayered_network_forward(
    all_weights, sensory_indices, inthroughtime, *, num_layers, threshold=0.01,
    tanh_steepness=5.0, weights_dtype=jnp.bfloat16, prepared_weights=None,
    time_major_output=False,
):
    """JAX/Pallas equivalent of MultilayeredNetwork.forward.

    all_weights:      (N, N) float32 connectome (input neurons in columns).
                      Ignored if `prepared_weights` is given.
    sensory_indices:  (S,)   int32 indices of sensory neurons (assumed unique,
                      matching the PyTorch `x[idx] += inp` semantics).
    inthroughtime:    (S, T) float32 sensory input through time (T == num_layers).
    weights_dtype:    jnp.bfloat16 (default; halves the MXU weight feed and the
                      resident VMEM) or jnp.float32 (bit-exact vs. the PyTorch
                      reference — the bf16 path downcasts the recurrent state
                      before each matmul, which can flip activations right at
                      the hard threshold).
    prepared_weights: optional result of prepare_weights() so repeat calls skip
                      the (Np,Np) pad/transpose/cast HBM round-trip.
    Returns: (N, T) activations (PyTorch axis convention), or (T, N) lane-dense
             if time_major_output=True (cheaper if downstream can consume it).
    """
    if prepared_weights is None:
        wt, N = prepare_weights(all_weights, weights_dtype)
    else:
        wt, N = prepared_weights
    Np = wt.shape[0]
    T = int(num_layers)
    assert inthroughtime.shape[1] == T

    # --- glue (plain JAX): preprocess + scatter the sensory input -------------
    pre = jnp.where(inthroughtime >= threshold, inthroughtime, 0.0)
    pre = jnp.tanh(pre).astype(jnp.float32)                          # (S, T)
    u_full = jnp.zeros((N, T), jnp.float32).at[sensory_indices, :].set(pre)
    u_tm = jnp.zeros((T, Np), jnp.float32).at[:, :N].set(u_full.T)   # (T, Np)

    kernel = functools.partial(
        _mln_kernel, threshold=float(threshold),
        steepness=float(tanh_steepness), num_layers=T,
    )

    # --- chip-aware VMEM budget ------------------------------------------------
    w_bytes = Np * Np * np.dtype(wt.dtype).itemsize
    io_bytes = 2 * T * Np * 4
    need = int((w_bytes + io_bytes) * 1.1) + (2 << 20)
    try:
        vmem_cap = int(pltpu.get_tpu_info().vmem_capacity_bytes)
    except Exception:
        vmem_cap = 64 << 20          # conservative floor (v7x per-TC VMEM)
    usable = vmem_cap - (8 << 20)    # leave headroom for Mosaic internals
    if need > usable:
        raise ValueError(
            f"Connectome too large for single-resident plan on this chip "
            f"(need ~{need >> 20} MiB, usable VMEM ~{usable >> 20} MiB). "
            "Use weights_dtype=jnp.bfloat16 or the streaming variant "
            "(TODO(synk))."
        )
    vmem_limit = int(min(max(need, 32 << 20), usable))

    out_tm = pl.pallas_call(
        kernel,
        out_shape=jax.ShapeDtypeStruct((T, Np), jnp.float32),
        in_specs=[
            pl.BlockSpec(memory_space=pltpu.MemorySpace.VMEM),  # W.T resident
            pl.BlockSpec(memory_space=pltpu.MemorySpace.VMEM),  # U resident
        ],
        out_specs=pl.BlockSpec(memory_space=pltpu.MemorySpace.VMEM),
        compiler_params=pltpu.CompilerParams(vmem_limit_bytes=vmem_limit),
        cost_estimate=pl.CostEstimate(
            flops=2 * T * Np * Np,
            transcendentals=T * Np,
            bytes_accessed=w_bytes + io_bytes,
        ),
    )(wt, u_tm)

    out_tm = out_tm[:, :N]                                      # drop padding
    if time_major_output:
        return out_tm                                           # (T, N)
    return out_tm.T                                             # (N, T)


def _reference_forward(W, sensory_indices, inthroughtime, num_layers, threshold,
                       steepness):
    """Pure-numpy reference mirroring the PyTorch code."""
    W = np.asarray(W, np.float32)
    inp = np.asarray(inthroughtime, np.float32)
    idx = np.asarray(sensory_indices)
    inp = np.where(inp >= threshold, inp, 0.0)
    inp = np.tanh(inp)
    acts = []
    x = W[:, idx] @ inp[:, 0]
    x = np.where(x >= threshold, x, 0.0)
    x = np.tanh(steepness * x)
    acts.append(x)
    for i in range(1, num_layers):
        x = W @ x
        x = x.copy()
        x[idx] += inp[:, i]
        x = np.where(x >= threshold, x, 0.0)
        x = np.tanh(steepness * x)
        acts.append(x)
    return np.stack(acts, axis=1)


if __name__ == "__main__":
    N = 256          # total neurons
    S = 32           # sensory neurons
    T = 8            # num_layers / time steps
    THRESHOLD = 0.01
    STEEPNESS = 5.0

    key = jax.random.PRNGKey(0)
    k_w, k_idx, k_in = jax.random.split(key, 3)

    # Deterministic "connectome" weights and sensory indices.
    all_weights = jax.random.normal(k_w, (N, N), jnp.float32) * 0.05
    sensory_indices = jnp.sort(
        jax.random.permutation(k_idx, jnp.arange(N, dtype=jnp.int32))[:S]
    )
    inthroughtime = jax.random.uniform(k_in, (S, T), jnp.float32)

    # f32 weight path: bit-exact check against the numpy reference.
    wt_f32 = prepare_weights(all_weights, jnp.float32)
    out = multilayered_network_forward(
        all_weights, sensory_indices, inthroughtime,
        num_layers=T, threshold=THRESHOLD, tanh_steepness=STEEPNESS,
        weights_dtype=jnp.float32, prepared_weights=wt_f32,
    )
    out = jax.block_until_ready(out)
    ref = _reference_forward(
        all_weights, sensory_indices, inthroughtime, T, THRESHOLD, STEEPNESS
    )
    np.testing.assert_allclose(np.asarray(out), ref, rtol=1e-5, atol=1e-5)

    # bf16-weight default path (halved MXU feed / VMEM): sanity check only —
    # threshold flips near z==threshold can legitimately diverge through the
    # recurrence, so only the f32 path is compared bit-for-bit.
    wt_bf16 = prepare_weights(all_weights, jnp.bfloat16)
    out_bf16 = multilayered_network_forward(
        all_weights, sensory_indices, inthroughtime,
        num_layers=T, threshold=THRESHOLD, tanh_steepness=STEEPNESS,
        prepared_weights=wt_bf16,
    )
    out_bf16 = np.asarray(jax.block_until_ready(out_bf16))
    assert out_bf16.shape == (N, T)
    assert np.all(np.isfinite(out_bf16))
    assert np.all(np.abs(out_bf16) <= 1.0)   # tanh-bounded

    print("KERNEL_OK")
</pallas_src>

<mosaic_0001>
module attributes {stable_mosaic.version = 11 : i64} {
  func.func @_mln_kernel(%arg0: memref<256x256xf32, #tpu.memory_space<vmem>>, %arg1: memref<8x256xf32, #tpu.memory_space<vmem>>, %arg2: memref<8x256xf32, #tpu.memory_space<vmem>>) attributes {dimension_semantics = [], scalar_prefetch = 0 : i64, scratch_operands = 0 : i64, tpu.core_type = #tpu.core_type<tc>} {
    %c0 = arith.constant 0 : index
    %c0_0 = arith.constant 0 : index
    %0 = vector.load %arg1[%c0, %c0_0] : memref<8x256xf32, #tpu.memory_space<vmem>>, vector<1x256xf32>
    %c0_1 = arith.constant 0 : index
    %c0_2 = arith.constant 0 : index
    %1 = vector.load %arg0[%c0_1, %c0_2] : memref<256x256xf32, #tpu.memory_space<vmem>>, vector<256x256xf32>
    %cst = arith.constant dense<0.000000e+00> : vector<1x256xf32>
    %2 = tpu.matmul %0, %1, %cst {dimension_numbers = #tpu.dot_dimension_numbers<[1], [0], [0], [1], [0, 0, 1, 1], [], []>} : vector<1x256xf32>, vector<256x256xf32>, vector<1x256xf32> -> vector<1x256xf32>
    %cst_3 = arith.constant 0.00999999977 : f32
    %3 = vector.broadcast %cst_3 : f32 to vector<1x256xf32>
    %4 = arith.cmpf oge, %2, %3 : vector<1x256xf32>
    %cst_4 = arith.constant 0.000000e+00 : f32
    %5 = vector.broadcast %cst_4 : f32 to vector<1x256xf32>
    %6 = arith.select %4, %2, %5 : vector<1x256xi1>, vector<1x256xf32>
    %cst_5 = arith.constant 5.000000e+00 : f32
    %7 = vector.broadcast %cst_5 : f32 to vector<1x256xf32>
    %8 = arith.mulf %7, %6 : vector<1x256xf32>
    %9 = math.tanh %8 : vector<1x256xf32>
    %c0_6 = arith.constant 0 : index
    %c0_7 = arith.constant 0 : index
    %10 = vector.load %arg2[%c0_6, %c0_7] : memref<8x256xf32, #tpu.memory_space<vmem>>, vector<1x256xf32>
    tpu.vector_store %arg2[%c0_6, %c0_7], %9 {strides = array<i32>} : memref<8x256xf32, #tpu.memory_space<vmem>>, vector<1x256xf32>,
    %c1_i32 = arith.constant 1 : i32
    %c0_8 = arith.constant 0 : index
    %c0_9 = arith.constant 0 : index
    %11 = vector.load %arg0[%c0_8, %c0_9] : memref<256x256xf32, #tpu.memory_space<vmem>>, vector<256x256xf32>
    %cst_10 = arith.constant dense<0.000000e+00> : vector<1x256xf32>
    %12 = tpu.matmul %9, %11, %cst_10 {dimension_numbers = #tpu.dot_dimension_numbers<[1], [0], [0], [1], [0, 0, 1, 1], [], []>} : vector<1x256xf32>, vector<256x256xf32>, vector<1x256xf32> -> vector<1x256xf32>
    %13 = arith.index_cast %c1_i32 : i32 to index
    %c0_11 = arith.constant 0 : index
    %14 = vector.load %arg1[%13, %c0_11] : memref<8x256xf32, #tpu.memory_space<vmem>>, vector<1x256xf32>
    %15 = arith.addf %12, %14 : vector<1x256xf32>
    %cst_12 = arith.constant 0.00999999977 : f32
    %16 = vector.broadcast %cst_12 : f32 to vector<1x256xf32>
    %17 = arith.cmpf oge, %15, %16 : vector<1x256xf32>
    %cst_13 = arith.constant 0.000000e+00 : f32
    %18 = vector.broadcast %cst_13 : f32 to vector<1x256xf32>
    %19 = arith.select %17, %15, %18 : vector<1x256xi1>, vector<1x256xf32>
    %cst_14 = arith.constant 5.000000e+00 : f32
    %20 = vector.broadcast %cst_14 : f32 to vector<1x256xf32>
    %21 = arith.mulf %20, %19 : vector<1x256xf32>
    %22 = math.tanh %21 : vector<1x256xf32>
    %23 = arith.index_cast %c1_i32 : i32 to index
    %c0_15 = arith.constant 0 : index
    %24 = vector.load %arg2[%23, %c0_15] : memref<8x256xf32, #tpu.memory_space<vmem>>, vector<1x256xf32>
    tpu.vector_store %arg2[%23, %c0_15], %22 {strides = array<i32>} : memref<8x256xf32, #tpu.memory_space<vmem>>, vector<1x256xf32>,
    %c2_i32 = arith.constant 2 : i32
    %c0_16 = arith.constant 0 : index
    %c0_17 = arith.constant 0 : index
    %25 = vector.load %arg0[%c0_16, %c0_17] : memref<256x256xf32, #tpu.memory_space<vmem>>, vector<256x256xf32>
    %cst_18 = arith.constant dense<0.000000e+00> : vector<1x256xf32>
    %26 = tpu.matmul %22, %25, %cst_18 {dimension_numbers = #tpu.dot_dimension_numbers<[1], [0], [0], [1], [0, 0, 1, 1], [], []>} : vector<1x256xf32>, vector<256x256xf32>, vector<1x256xf32> -> vector<1x256xf32>
    %27 = arith.index_cast %c2_i32 : i32 to index
    %c0_19 = arith.constant 0 : index
    %28 = vector.load %arg1[%27, %c0_19] : memref<8x256xf32, #tpu.memory_space<vmem>>, vector<1x256xf32>
    %29 = arith.addf %26, %28 : vector<1x256xf32>
    %cst_20 = arith.constant 0.00999999977 : f32
    %30 = vector.broadcast %cst_20 : f32 to vector<1x256xf32>
    %31 = arith.cmpf oge, %29, %30 : vector<1x256xf32>
    %cst_21 = arith.constant 0.000000e+00 : f32
    %32 = vector.broadcast %cst_21 : f32 to vector<1x256xf32>
    %33 = arith.select %31, %29, %32 : vector<1x256xi1>, vector<1x256xf32>
    %cst_22 = arith.constant 5.000000e+00 : f32
    %34 = vector.broadcast %cst_22 : f32 to vector<1x256xf32>
    %35 = arith.mulf %34, %33 : vector<1x256xf32>
    %36 = math.tanh %35 : vector<1x256xf32>
    %37 = arith.index_cast %c2_i32 : i32 to index
    %c0_23 = arith.constant 0 : index
    %38 = vector.load %arg2[%37, %c0_23] : memref<8x256xf32, #tpu.memory_space<vmem>>, vector<1x256xf32>
    tpu.vector_store %arg2[%37, %c0_23], %36 {strides = array<i32>} : memref<8x256xf32, #tpu.memory_space<vmem>>, vector<1x256xf32>,
    %c3_i32 = arith.constant 3 : i32
    %c0_24 = arith.constant 0 : index
    %c0_25 = arith.constant 0 : index
    %39 = vector.load %arg0[%c0_24, %c0_25] : memref<256x256xf32, #tpu.memory_space<vmem>>, vector<256x256xf32>
    %cst_26 = arith.constant dense<0.000000e+00> : vector<1x256xf32>
    %40 = tpu.matmul %36, %39, %cst_26 {dimension_numbers = #tpu.dot_dimension_numbers<[1], [0], [0], [1], [0, 0, 1, 1], [], []>} : vector<1x256xf32>, vector<256x256xf32>, vector<1x256xf32> -> vector<1x256xf32>
    %41 = arith.index_cast %c3_i32 : i32 to index
    %c0_27 = arith.constant 0 : index
    %42 = vector.load %arg1[%41, %c0_27] : memref<8x256xf32, #tpu.memory_space<vmem>>, vector<1x256xf32>
    %43 = arith.addf %40, %42 : vector<1x256xf32>
    %cst_28 = arith.constant 0.00999999977 : f32
    %44 = vector.broadcast %cst_28 : f32 to vector<1x256xf32>
    %45 = arith.cmpf oge, %43, %44 : vector<1x256xf32>
    %cst_29 = arith.constant 0.000000e+00 : f32
    %46 = vector.broadcast %cst_29 : f32 to vector<1x256xf32>
    %47 = arith.select %45, %43, %46 : vector<1x256xi1>, vector<1x256xf32>
    %cst_30 = arith.constant 5.000000e+00 : f32
    %48 = vector.broadcast %cst_30 : f32 to vector<1x256xf32>
    %49 = arith.mulf %48, %47 : vector<1x256xf32>
    %50 = math.tanh %49 : vector<1x256xf32>
    %51 = arith.index_cast %c3_i32 : i32 to index
    %c0_31 = arith.constant 0 : index
    %52 = vector.load %arg2[%51, %c0_31] : memref<8x256xf32, #tpu.memory_space<vmem>>, vector<1x256xf32>
    tpu.vector_store %arg2[%51, %c0_31], %50 {strides = array<i32>} : memref<8x256xf32, #tpu.memory_space<vmem>>, vector<1x256xf32>,
    %c4_i32 = arith.constant 4 : i32
    %c0_32 = arith.constant 0 : index
    %c0_33 = arith.constant 0 : index
    %53 = vector.load %arg0[%c0_32, %c0_33] : memref<256x256xf32, #tpu.memory_space<vmem>>, vector<256x256xf32>
    %cst_34 = arith.constant dense<0.000000e+00> : vector<1x256xf32>
    %54 = tpu.matmul %50, %53, %cst_34 {dimension_numbers = #tpu.dot_dimension_numbers<[1], [0], [0], [1], [0, 0, 1, 1], [], []>} : vector<1x256xf32>, vector<256x256xf32>, vector<1x256xf32> -> vector<1x256xf32>
    %55 = arith.index_cast %c4_i32 : i32 to index
    %c0_35 = arith.constant 0 : index
    %56 = vector.load %arg1[%55, %c0_35] : memref<8x256xf32, #tpu.memory_space<vmem>>, vector<1x256xf32>
    %57 = arith.addf %54, %56 : vector<1x256xf32>
    %cst_36 = arith.constant 0.00999999977 : f32
    %58 = vector.broadcast %cst_36 : f32 to vector<1x256xf32>
    %59 = arith.cmpf oge, %57, %58 : vector<1x256xf32>
    %cst_37 = arith.constant 0.000000e+00 : f32
    %60 = vector.broadcast %cst_37 : f32 to vector<1x256xf32>
    %61 = arith.select %59, %57, %60 : vector<1x256xi1>, vector<1x256xf32>
    %cst_38 = arith.constant 5.000000e+00 : f32
    %62 = vector.broadcast %cst_38 : f32 to vector<1x256xf32>
    %63 = arith.mulf %62, %61 : vector<1x256xf32>
    %64 = math.tanh %63 : vector<1x256xf32>
    %65 = arith.index_cast %c4_i32 : i32 to index
    %c0_39 = arith.constant 0 : index
    %66 = vector.load %arg2[%65, %c0_39] : memref<8x256xf32, #tpu.memory_space<vmem>>, vector<1x256xf32>
    tpu.vector_store %arg2[%65, %c0_39], %64 {strides = array<i32>} : memref<8x256xf32, #tpu.memory_space<vmem>>, vector<1x256xf32>,
    %c5_i32 = arith.constant 5 : i32
    %c0_40 = arith.constant 0 : index
    %c0_41 = arith.constant 0 : index
    %67 = vector.load %arg0[%c0_40, %c0_41] : memref<256x256xf32, #tpu.memory_space<vmem>>, vector<256x256xf32>
    %cst_42 = arith.constant dense<0.000000e+00> : vector<1x256xf32>
    %68 = tpu.matmul %64, %67, %cst_42 {dimension_numbers = #tpu.dot_dimension_numbers<[1], [0], [0], [1], [0, 0, 1, 1], [], []>} : vector<1x256xf32>, vector<256x256xf32>, vector<1x256xf32> -> vector<1x256xf32>
    %69 = arith.index_cast %c5_i32 : i32 to index
    %c0_43 = arith.constant 0 : index
    %70 = vector.load %arg1[%69, %c0_43] : memref<8x256xf32, #tpu.memory_space<vmem>>, vector<1x256xf32>
    %71 = arith.addf %68, %70 : vector<1x256xf32>
    %cst_44 = arith.constant 0.00999999977 : f32
    %72 = vector.broadcast %cst_44 : f32 to vector<1x256xf32>
    %73 = arith.cmpf oge, %71, %72 : vector<1x256xf32>
    %cst_45 = arith.constant 0.000000e+00 : f32
    %74 = vector.broadcast %cst_45 : f32 to vector<1x256xf32>
    %75 = arith.select %73, %71, %74 : vector<1x256xi1>, vector<1x256xf32>
    %cst_46 = arith.constant 5.000000e+00 : f32
    %76 = vector.broadcast %cst_46 : f32 to vector<1x256xf32>
    %77 = arith.mulf %76, %75 : vector<1x256xf32>
    %78 = math.tanh %77 : vector<1x256xf32>
    %79 = arith.index_cast %c5_i32 : i32 to index
    %c0_47 = arith.constant 0 : index
    %80 = vector.load %arg2[%79, %c0_47] : memref<8x256xf32, #tpu.memory_space<vmem>>, vector<1x256xf32>
    tpu.vector_store %arg2[%79, %c0_47], %78 {strides = array<i32>} : memref<8x256xf32, #tpu.memory_space<vmem>>, vector<1x256xf32>,
    %c6_i32 = arith.constant 6 : i32
    %c0_48 = arith.constant 0 : index
    %c0_49 = arith.constant 0 : index
    %81 = vector.load %arg0[%c0_48, %c0_49] : memref<256x256xf32, #tpu.memory_space<vmem>>, vector<256x256xf32>
    %cst_50 = arith.constant dense<0.000000e+00> : vector<1x256xf32>
    %82 = tpu.matmul %78, %81, %cst_50 {dimension_numbers = #tpu.dot_dimension_numbers<[1], [0], [0], [1], [0, 0, 1, 1], [], []>} : vector<1x256xf32>, vector<256x256xf32>, vector<1x256xf32> -> vector<1x256xf32>
    %83 = arith.index_cast %c6_i32 : i32 to index
    %c0_51 = arith.constant 0 : index
    %84 = vector.load %arg1[%83, %c0_51] : memref<8x256xf32, #tpu.memory_space<vmem>>, vector<1x256xf32>
    %85 = arith.addf %82, %84 : vector<1x256xf32>
    %cst_52 = arith.constant 0.00999999977 : f32
    %86 = vector.broadcast %cst_52 : f32 to vector<1x256xf32>
    %87 = arith.cmpf oge, %85, %86 : vector<1x256xf32>
    %cst_53 = arith.constant 0.000000e+00 : f32
    %88 = vector.broadcast %cst_53 : f32 to vector<1x256xf32>
    %89 = arith.select %87, %85, %88 : vector<1x256xi1>, vector<1x256xf32>
    %cst_54 = arith.constant 5.000000e+00 : f32
    %90 = vector.broadcast %cst_54 : f32 to vector<1x256xf32>
    %91 = arith.mulf %90, %89 : vector<1x256xf32>
    %92 = math.tanh %91 : vector<1x256xf32>
    %93 = arith.index_cast %c6_i32 : i32 to index
    %c0_55 = arith.constant 0 : index
    %94 = vector.load %arg2[%93, %c0_55] : memref<8x256xf32, #tpu.memory_space<vmem>>, vector<1x256xf32>
    tpu.vector_store %arg2[%93, %c0_55], %92 {strides = array<i32>} : memref<8x256xf32, #tpu.memory_space<vmem>>, vector<1x256xf32>,
    %c7_i32 = arith.constant 7 : i32
    %c0_56 = arith.constant 0 : index
    %c0_57 = arith.constant 0 : index
    %95 = vector.load %arg0[%c0_56, %c0_57] : memref<256x256xf32, #tpu.memory_space<vmem>>, vector<256x256xf32>
    %cst_58 = arith.constant dense<0.000000e+00> : vector<1x256xf32>
    %96 = tpu.matmul %92, %95, %cst_58 {dimension_numbers = #tpu.dot_dimension_numbers<[1], [0], [0], [1], [0, 0, 1, 1], [], []>} : vector<1x256xf32>, vector<256x256xf32>, vector<1x256xf32> -> vector<1x256xf32>
    %97 = arith.index_cast %c7_i32 : i32 to index
    %c0_59 = arith.constant 0 : index
    %98 = vector.load %arg1[%97, %c0_59] : memref<8x256xf32, #tpu.memory_space<vmem>>, vector<1x256xf32>
    %99 = arith.addf %96, %98 : vector<1x256xf32>
    %cst_60 = arith.constant 0.00999999977 : f32
    %100 = vector.broadcast %cst_60 : f32 to vector<1x256xf32>
    %101 = arith.cmpf oge, %99, %100 : vector<1x256xf32>
    %cst_61 = arith.constant 0.000000e+00 : f32
    %102 = vector.broadcast %cst_61 : f32 to vector<1x256xf32>
    %103 = arith.select %101, %99, %102 : vector<1x256xi1>, vector<1x256xf32>
    %cst_62 = arith.constant 5.000000e+00 : f32
    %104 = vector.broadcast %cst_62 : f32 to vector<1x256xf32>
    %105 = arith.mulf %104, %103 : vector<1x256xf32>
    %106 = math.tanh %105 : vector<1x256xf32>
    %107 = arith.index_cast %c7_i32 : i32 to index
    %c0_63 = arith.constant 0 : index
    %108 = vector.load %arg2[%107, %c0_63] : memref<8x256xf32, #tpu.memory_space<vmem>>, vector<1x256xf32>
    tpu.vector_store %arg2[%107, %c0_63], %106 {strides = array<i32>} : memref<8x256xf32, #tpu.memory_space<vmem>>, vector<1x256xf32>,
    %c7_i32_64 = arith.constant 7 : i32
    return
  }
}

</mosaic_0001>

<bundles_post_ra>
// kernel: tpu_custom_call.1
= control target key start
LH: loop header
LB: loop body
LE: loop exit
PB: predicated region body
PF: predicated region fallthrough
CT: control target
= control target key end

     0   :  { %7 = vsyncpa [#allocation3], 0  ;;  %s2604_s0 = inlined_call_operand.hbm [shape: f32[256,256], index: 0, kind: input, shape index: {}]   ;;  %s2605_s1 = inlined_call_operand.hbm [shape: f32[8,256], index: 1, kind: input, shape index: {}]   ;;  %s2606_s2 = inlined_call_operand.hbm [shape: f32[8,256], index: 2, kind: output, shape index: {}]  }
   0x1   :  { %8 = vsyncpa [#allocation6], 0 }
   0x2   :  { %9 = vsyncpa [#allocation4], 0  ;;  %s2094_s9 = smov [#allocation2]   ;;  %s2022_s13 = scalar_lea.hbm %s2604_s0, 8192 }
   0x3   :  { %s15_s10 = sshll.u32 %s2094_s9, 4  ;;  %p2023_p0 = scmp.ne.s32.totalorder %s2604_s0, %s2022_s13  ;;  %s16_s10 = int_to_ptr.vmem [resolvable:$true] %s15_s10 }
   0x4   :  { %p2026_p1 = scmp.lt.u32.totalorder %s2022_s13, %s2604_s0 }
   0x6   :  { %p2028_p2 = pnand %p2026_p1, %p2023_p0 }
   0x8   :  { %2031 = shalt.err (!%p2028_p2)
}
   0x9   :  { %s2032_s18 = scalar_lea.vmem %s16_s10, 8192  ;;  %p2037_p4 = scmp.lt.s32.totalorder %s16_s10, %s16_s10 }
   0xa   :  { %p2033_p3 = scmp.ne.s32.totalorder %s16_s10, %s2032_s18  ;;  %p2038_p5 = scmp.lt.s32.totalorder %s2032_s18, %s2032_s18 }
   0xc   :  { %p2039_p6 = por %p2038_p5, %p2037_p4 }
   0xe   :  { %p2040_p7 = pnand %p2039_p6, %p2033_p3 }
  0x10   :  { %2043 = shalt.err (!%p2040_p7)
}
  0x11   :  { %s2095_s19 = smov 256   ;;  %s2096_s20 = smov 16  }
  0x12   :  { %21 = dma.hbm_to_vmem [thread:$0]  %s2604_s0, 8192, %s16_s10, [#allocation3], %s2095_s19, %s2095_s19, %s2096_s20  }
  0x13   :  { %s2097_s23 = smov [#allocation5]   ;;  %s2044_s27 = scalar_lea.hbm %s2605_s1, 256 }
  0x14   :  { %s28_s24 = sshll.u32 %s2097_s23, 4  ;;  %p2045_p8 = scmp.ne.s32.totalorder %s2605_s1, %s2044_s27  ;;  %s29_s24 = int_to_ptr.vmem [resolvable:$true] %s28_s24 }
  0x15   :  { %p2048_p9 = scmp.lt.u32.totalorder %s2044_s27, %s2605_s1 }
  0x17   :  { %p2050_p10 = pnand %p2048_p9, %p2045_p8 }
  0x19   :  { %2053 = shalt.err (!%p2050_p10)
}
  0x1a   :  { %s2054_s4 = scalar_lea.vmem %s29_s24, 256  ;;  %p2059_p12 = scmp.lt.s32.totalorder %s29_s24, %s29_s24 }
  0x1b   :  { %p2055_p11 = scmp.ne.s32.totalorder %s29_s24, %s2054_s4  ;;  %p2060_p13 = scmp.lt.s32.totalorder %s2054_s4, %s2054_s4 }
  0x1d   :  { %p2061_p0 = por %p2060_p13, %p2059_p12 }
  0x1f   :  { %p2062_p1 = pnand %p2061_p0, %p2055_p11 }
  0x21   :  { %2065 = shalt.err (!%p2062_p1)
}
  0x22   :  { %31 = dma.hbm_to_vmem [thread:$0]  %s2605_s1, 256, %s29_s24, [#allocation6]  }
  0x23   :  { %2088 = dma.done.wait [#allocation3], 8192  }
  0x24   :  { %2089 = vsyncadd [#allocation3], 4294959104 }
  0x25   :  { %2090 = dma.done.wait [#allocation6], 256  }
  0x26   :  { %2091 = vsyncadd [#allocation6], 4294967040  ;;  %v40_v0 = vld [vmem:[#allocation2 + $0x8] sm:$0xff]  ;;  %v42_v1 = vld [vmem:[#allocation2 + $0x18] sm:$0xff]  ;;  %v104_v25 = vlaneseq  ;;  %s2099_s1 = smov [#allocation7]  }
  0x27   :  { %v39_v2 = vld [vmem:[#allocation2] sm:$0xff]  ;;  %v2139_v3 = vpack.c.bf16 %v42_v1, %v40_v0  ;;  %v41_v4 = vld [vmem:[#allocation2 + $0x10] sm:$0xff]  ;;  %v44_v5 = vld [vmem:[#allocation2 + $0x28] sm:$0xff]  ;;  %s1462_s6 = sshll.u32 %s2099_s1, 4  ;;  %s1463_s6 = int_to_ptr.vmem [resolvable:$true] %s1462_s6 }
  0x28   :  { %v46_v6 = vld [vmem:[#allocation2 + $0x38] sm:$0xff]  ;;  %v2141_v7 = vpack.c.bf16 %v41_v4, %v39_v2  ;;  %v43_v9 = vld [vmem:[#allocation2 + $0x20] sm:$0xff]  ;;  %v45_v10 = vld [vmem:[#allocation2 + $0x30] sm:$0xff]  ;;  %v2172_v32 = vshrl.u32 %v104_v25, 7  ;;  %vm2321_vm2 = vcmp.lt.s32.totalorder %v104_v25, 256  ;;  %s2066_s7 = scalar_lea.vmem %s1463_s6, 256  ;;  %p2071_p3 = scmp.lt.s32.totalorder %s1463_s6, %s1463_s6 }
  0x29   :  { %v2143_v8 = vpack.c.bf16 %v46_v6, %v44_v5  ;;  %v48_v11 = vld [vmem:[#allocation2 + $0x48] sm:$0xff]  ;;  %1473 = vmatprep.subr.bf16.mxu0 %v2139_v3  ;;  %v50_v12 = vld [vmem:[#allocation2 + $0x58] sm:$0xff]  ;;  %1537 = vmatprep.subr.bf16.mxu1 %v2139_v3  ;;  %v2148_v13 = vpack.c.bf16 %v45_v10, %v43_v9  ;;  %v47_v15 = vld [vmem:[#allocation2 + $0x40] sm:$0xff]  ;;  %p2067_p2 = scmp.ne.s32.totalorder %s1463_s6, %s2066_s7  ;;  %p2072_p4 = scmp.lt.s32.totalorder %s2066_s7, %s2066_s7 }
  0x2a   :  { %1475 = vmatpush1.bf16.msra.mxu0 %v2141_v7  ;;  %1539 = vmatpush1.bf16.msra.mxu1 %v2141_v7  ;;  %v2152_v14 = vpack.c.bf16 %v50_v12, %v48_v11  ;;  %v49_v16 = vld [vmem:[#allocation2 + $0x50] sm:$0xff]  ;;  %v52_v17 = vld [vmem:[#allocation2 + $0x68] sm:$0xff]  ;;  %v54_v18 = vld [vmem:[#allocation2 + $0x78] sm:$0xff]  ;;  %v2183_v39 = vsub.s32 1, %v2172_v32 }
  0x2b   :  { %1477 = vmatprep.subr.bf16.mxu0 %v2143_v8  ;;  %1541 = vmatprep.subr.bf16.mxu1 %v2143_v8  ;;  %v2156_v19 = vpack.c.bf16 %v49_v16, %v47_v15  ;;  %v2160_v20 = vpack.c.bf16 %v54_v18, %v52_v17  ;;  %v51_v21 = vld [vmem:[#allocation2 + $0x60] sm:$0xff]  ;;  %v53_v22 = vld [vmem:[#allocation2 + $0x70] sm:$0xff]  ;;  %v56_v23 = vld [vmem:[#allocation2 + $0x88] sm:$0xff]  ;;  %p2073_p5 = por %p2072_p4, %p2071_p3 }
  0x2c   :  { %v58_v24 = vld [vmem:[#allocation2 + $0x98] sm:$0xff]  ;;  %v2164_v26 = vpack.c.bf16 %v53_v22, %v51_v21  ;;  %v55_v28 = vld [vmem:[#allocation2 + $0x80] sm:$0xff]  ;;  %v57_v29 = vld [vmem:[#allocation2 + $0x90] sm:$0xff] }
  0x2d   :  { %v2168_v27 = vpack.c.bf16 %v58_v24, %v56_v23  ;;  %v60_v30 = vld [vmem:[#allocation2 + $0xa8] sm:$0xff]  ;;  %v62_v31 = vld [vmem:[#allocation2 + $0xb8] sm:$0xff]  ;;  %v2175_v33 = vpack.c.bf16 %v57_v29, %v55_v28  ;;  %v59_v35 = vld [vmem:[#allocation2 + $0xa0] sm:$0xff]  ;;  %p2074_p6 = pnand %p2073_p5, %p2067_p2 }
  0x2e   :  { %1479 = vmatpush1.bf16.msra.mxu0 %v2148_v13  ;;  %1543 = vmatpush1.bf16.msra.mxu1 %v2148_v13  ;;  %v2179_v34 = vpack.c.bf16 %v62_v31, %v60_v30  ;;  %v61_v36 = vld [vmem:[#allocation2 + $0xb0] sm:$0xff]  ;;  %v64_v37 = vld [vmem:[#allocation2 + $0xc8] sm:$0xff]  ;;  %v66_v38 = vld [vmem:[#allocation2 + $0xd8] sm:$0xff] }
  0x2f   :  { %1481 = vmatprep.subr.bf16.mxu0 %v2152_v14  ;;  %1545 = vmatprep.subr.bf16.mxu1 %v2152_v14  ;;  %v2186_v40 = vpack.c.bf16 %v61_v36, %v59_v35  ;;  %v2190_v41 = vpack.c.bf16 %v66_v38, %v64_v37  ;;  %v63_v42 = vld [vmem:[#allocation2 + $0xc0] sm:$0xff]  ;;  %v65_v43 = vld [vmem:[#allocation2 + $0xd0] sm:$0xff]  ;;  %v68_v45 = vld [vmem:[#allocation2 + $0xe8] sm:$0xff] }
  0x30   :  { %v2192_v44 = vld [vmem:[#allocation5] ss:$8 sm:$0x3]  ;;  %v70_v46 = vld [vmem:[#allocation2 + $0xf8] sm:$0xff]  ;;  %v2198_v48 = vpack.c.bf16 %v65_v43, %v63_v42  ;;  %v69_v51 = vld [vmem:[#allocation2 + $0xf0] sm:$0xff] }
  0x31   :  { %v111_v47 = vrot.slane %v2192_v44, %v2183_v39  ;;  %v2201_v49 = vpack.c.bf16 %v70_v46, %v68_v45  ;;  %v67_v50 = vld [vmem:[#allocation2 + $0xe0] sm:$0xff]  ;;  %v72_v52 = vld [vmem:[#allocation2 + $0x108] sm:$0xff]  ;;  %v74_v53 = vld [vmem:[#allocation2 + $0x118] sm:$0xff] }
  0x32   :  { %1483 = vmatpush1.bf16.msra.mxu0 %v2156_v19  ;;  %1547 = vmatpush1.bf16.msra.mxu1 %v2156_v19  ;;  %v2206_v54 = vpack.c.bf16 %v69_v51, %v67_v50  ;;  %v2209_v55 = vpack.c.bf16 %v74_v53, %v72_v52  ;;  %v71_v56 = vld [vmem:[#allocation2 + $0x100] sm:$0xff]  ;;  %v73_v57 = vld [vmem:[#allocation2 + $0x110] sm:$0xff]  ;;  %v76_v58 = vld [vmem:[#allocation2 + $0x128] sm:$0xff] }
  0x33   :  { %1485 = vmatprep.subr.bf16.mxu0 %v2160_v20  ;;  %1549 = vmatprep.subr.bf16.mxu1 %v2160_v20  ;;  %v78_v59 = vld [vmem:[#allocation2 + $0x138] sm:$0xff]  ;;  %v2214_v60 = vpack.c.bf16 %v73_v57, %v71_v56  ;;  %v75_v62 = vld [vmem:[#allocation2 + $0x120] sm:$0xff]  ;;  %v77_v63 = vld [vmem:[#allocation2 + $0x130] sm:$0xff]  ;;  %v2270_v57 = vsub.s32 0, %v2172_v32 }
  0x34   :  { %178 = vmatprep.mubr.f32.mxu0 %v111_v47  ;;  %v2217_v61 = vpack.c.bf16 %v78_v59, %v76_v58  ;;  %v80_v0 = vld [vmem:[#allocation2 + $0x148] sm:$0xff]  ;;  %v82_v1 = vld [vmem:[#allocation2 + $0x158] sm:$0xff]  ;;  %v2222_v2 = vpack.c.bf16 %v77_v63, %v75_v62  ;;  %v79_v5 = vld [vmem:[#allocation2 + $0x140] sm:$0xff] }
  0x35   :  { %v2225_v4 = vpack.c.bf16 %v82_v1, %v80_v0  ;;  %v81_v6 = vld [vmem:[#allocation2 + $0x150] sm:$0xff]  ;;  %v84_v9 = vld [vmem:[#allocation2 + $0x168] sm:$0xff]  ;;  %v86_v10 = vld [vmem:[#allocation2 + $0x178] sm:$0xff]  ;;  %v107_v59 = vrot.slane %v2192_v44, %v2270_v57 }
  0x36   :  { %1487 = vmatpush1.bf16.msra.mxu0 %v2164_v26  ;;  %1551 = vmatpush1.bf16.msra.mxu1 %v2164_v26  ;;  %v2230_v11 = vpack.c.bf16 %v81_v6, %v79_v5  ;;  %v2233_v12 = vpack.c.bf16 %v86_v10, %v84_v9  ;;  %v83_v15 = vld [vmem:[#allocation2 + $0x160] sm:$0xff]  ;;  %v85_v16 = vld [vmem:[#allocation2 + $0x170] sm:$0xff]  ;;  %v88_v17 = vld [vmem:[#allocation2 + $0x188] sm:$0xff]  ;;  %v2098_v5 = vmov 1966171168  }
  0x37   :  { %1489 = vmatprep.subr.bf16.mxu0 %v2168_v27  ;;  %1553 = vmatprep.subr.bf16.mxu1 %v2168_v27  ;;  %v90_v18 = vld [vmem:[#allocation2 + $0x198] sm:$0xff]  ;;  %v2238_v21 = vpack.c.bf16 %v85_v16, %v83_v15  ;;  %v87_v23 = vld [vmem:[#allocation2 + $0x180] sm:$0xff]  ;;  %v89_v24 = vld [vmem:[#allocation2 + $0x190] sm:$0xff]  ;;  %v197_v6 = vunpack.c.l.s4 %v2098_v5 }
  0x38   :  { %v2241_v22 = vpack.c.bf16 %v90_v18, %v88_v17  ;;  %v92_v28 = vld [vmem:[#allocation2 + $0x1a8] sm:$0xff]  ;;  %v94_v29 = vld [vmem:[#allocation2 + $0x1b8] sm:$0xff]  ;;  %v2246_v30 = vpack.c.bf16 %v89_v24, %v87_v23  ;;  %v91_v35 = vld [vmem:[#allocation2 + $0x1a0] sm:$0xff] }
  0x39   :  { %v2249_v31 = vpack.c.bf16 %v94_v29, %v92_v28  ;;  %v93_v36 = vld [vmem:[#allocation2 + $0x1b0] sm:$0xff]  ;;  %v96_v37 = vld [vmem:[#allocation2 + $0x1c8] sm:$0xff]  ;;  %v98_v38 = vld [vmem:[#allocation2 + $0x1d8] sm:$0xff]  ;;  %v198_v9 = vunpack.c.0.s8 %v197_v6 }
  0x3a   :  { %1491 = vmatpush1.bf16.msra.mxu0 %v2175_v33  ;;  %1555 = vmatpush1.bf16.msra.mxu1 %v2175_v33  ;;  %v2254_v42 = vpack.c.bf16 %v93_v36, %v91_v35  ;;  %v2257_v43 = vpack.c.bf16 %v98_v38, %v96_v37  ;;  %v95_v45 = vld [vmem:[#allocation2 + $0x1c0] sm:$0xff]  ;;  %v97_v46 = vld [vmem:[#allocation2 + $0x1d0] sm:$0xff]  ;;  %v100_v47 = vld [vmem:[#allocation2 + $0x1e8] sm:$0xff] }
  0x3b   :  { %1493 = vmatprep.subr.bf16.mxu0 %v2179_v34  ;;  %1557 = vmatprep.subr.bf16.mxu1 %v2179_v34  ;;  %v102_v50 = vld [vmem:[#allocation2 + $0x1f8] sm:$0xff]  ;;  %v2262_v51 = vpack.c.bf16 %v97_v46, %v95_v45  ;;  %v99_v53 = vld [vmem:[#allocation2 + $0x1e0] sm:$0xff]  ;;  %v101_v56 = vld [vmem:[#allocation2 + $0x1f0] sm:$0xff]  ;;  %v2316_v15 = vsub.s32 %v198_v9, %v2172_v32 }
  0x3c   :  { %v2265_v52 = vpack.c.bf16 %v102_v50, %v100_v47  ;;  %v2273_v58 = vpack.c.bf16 %v101_v56, %v99_v53  ;;  %v754_v28 = vld [vmem:[#allocation2 + $0x30] sm:$0xff]  ;;  %v757_v29 = vld [vmem:[#allocation2 + $0x48] sm:$0xff]  ;;  %v756_v36 = vld [vmem:[#allocation2 + $0x40] sm:$0xff] }
  0x3d   :  { %v758_v37 = vld [vmem:[#allocation2 + $0x50] sm:$0xff]  ;;  %v761_v38 = vld [vmem:[#allocation2 + $0x68] sm:$0xff]  ;;  %v760_v46 = vld [vmem:[#allocation2 + $0x60] sm:$0xff] }
  0x3e   :  { %1495 = vmatpush1.bf16.msra.mxu0 %v2186_v40  ;;  %1559 = vmatpush1.bf16.msra.mxu1 %v2186_v40  ;;  %v762_v47 = vld [vmem:[#allocation2 + $0x70] sm:$0xff]  ;;  %v765_v50 = vld [vmem:[#allocation2 + $0x88] sm:$0xff]  ;;  %v764_v56 = vld [vmem:[#allocation2 + $0x80] sm:$0xff] }
  0x3f   :  { %1497 = vmatprep.subr.bf16.mxu0 %v2190_v41  ;;  %1561 = vmatprep.subr.bf16.mxu1 %v2190_v41  ;;  %v775_v5 = vld [vmem:[#allocation2 + $0xd8] sm:$0xff] }
  0x42   :  { %1499 = vmatpush1.bf16.msra.mxu0 %v2198_v48  ;;  %1563 = vmatpush1.bf16.msra.mxu1 %v2198_v48 }
  0x43   :  { %1501 = vmatprep.subr.bf16.mxu0 %v2201_v49  ;;  %1565 = vmatprep.subr.bf16.mxu1 %v2201_v49 }
  0x46   :  { %1503 = vmatpush1.bf16.msra.mxu0 %v2206_v54  ;;  %1567 = vmatpush1.bf16.msra.mxu1 %v2206_v54 }
  0x47   :  { %1505 = vmatprep.subr.bf16.mxu0 %v2209_v55  ;;  %1569 = vmatprep.subr.bf16.mxu1 %v2209_v55 }
  0x4a   :  { %1507 = vmatpush1.bf16.msra.mxu0 %v2214_v60  ;;  %1571 = vmatpush1.bf16.msra.mxu1 %v2214_v60 }
  0x4b   :  { %1509 = vmatprep.subr.bf16.mxu0 %v2217_v61  ;;  %1573 = vmatprep.subr.bf16.mxu1 %v2217_v61 }
  0x4e   :  { %1511 = vmatpush1.bf16.msra.mxu0 %v2222_v2  ;;  %1575 = vmatpush1.bf16.msra.mxu1 %v2222_v2 }
  0x4f   :  { %1513 = vmatprep.subr.bf16.mxu0 %v2225_v4  ;;  %1577 = vmatprep.subr.bf16.mxu1 %v2225_v4 }
  0x52   :  { %1515 = vmatpush1.bf16.msra.mxu0 %v2230_v11  ;;  %1579 = vmatpush1.bf16.msra.mxu1 %v2230_v11 }
  0x53   :  { %1517 = vmatprep.subr.bf16.mxu0 %v2233_v12  ;;  %1581 = vmatprep.subr.bf16.mxu1 %v2233_v12 }
  0x56   :  { %1519 = vmatpush1.bf16.msra.mxu0 %v2238_v21  ;;  %1583 = vmatpush1.bf16.msra.mxu1 %v2238_v21 }
  0x57   :  { %1521 = vmatprep.subr.bf16.mxu0 %v2241_v22  ;;  %1585 = vmatprep.subr.bf16.mxu1 %v2241_v22 }
  0x5a   :  { %1523 = vmatpush1.bf16.msra.mxu0 %v2246_v30  ;;  %1587 = vmatpush1.bf16.msra.mxu1 %v2246_v30 }
  0x5b   :  { %1525 = vmatprep.subr.bf16.mxu0 %v2249_v31  ;;  %1589 = vmatprep.subr.bf16.mxu1 %v2249_v31 }
  0x5e   :  { %1527 = vmatpush1.bf16.msra.mxu0 %v2254_v42  ;;  %1591 = vmatpush1.bf16.msra.mxu1 %v2254_v42 }
  0x5f   :  { %1529 = vmatprep.subr.bf16.mxu0 %v2257_v43  ;;  %1593 = vmatprep.subr.bf16.mxu1 %v2257_v43 }
  0x62   :  { %1531 = vmatpush1.bf16.msra.mxu0 %v2262_v51  ;;  %1595 = vmatpush1.bf16.msra.mxu1 %v2262_v51 }
  0x63   :  { %1533 = vmatprep.subr.bf16.mxu0 %v2265_v52  ;;  %1597 = vmatprep.subr.bf16.mxu1 %v2265_v52 }
  0x66   :  { %1535 = vmatpush1.bf16.msra.mxu0 %v2273_v58  ;;  %1599 = vmatpush1.bf16.msra.mxu1 %v2273_v58 }
  0x67   :  { %1601 = vmatprep.subr.bf16.mxu0 %v2139_v3  ;;  %1665 = vmatprep.subr.bf16.mxu1 %v2139_v3 }
  0x69   :  { %179 = vmatmul.mubr.f32.vlgmr.msra.gmra.mrb[0].mxu0 %v107_v59  ;;  %v769_v59 = vld [vmem:[#allocation2 + $0xa8] sm:$0xff] }
  0x6a   :  { %1603 = vmatpush1.bf16.msra.mxu0 %v2141_v7 }
  0x6b   :  { %1605 = vmatprep.subr.bf16.mxu0 %v2143_v8 }
  0x6e   :  { %1607 = vmatpush1.bf16.msra.mxu0 %v2148_v13 }
  0x6f   :  { %1609 = vmatprep.subr.bf16.mxu0 %v2152_v14 }
  0x72   :  { %1611 = vmatpush1.bf16.msra.mxu0 %v2156_v19 }
  0x73   :  { %1613 = vmatprep.subr.bf16.mxu0 %v2160_v20 }
  0x76   :  { %1615 = vmatpush1.bf16.msra.mxu0 %v2164_v26 }
  0x77   :  { %1617 = vmatprep.subr.bf16.mxu0 %v2168_v27 }
  0x7a   :  { %1619 = vmatpush1.bf16.msra.mxu0 %v2175_v33 }
  0x7b   :  { %1621 = vmatprep.subr.bf16.mxu0 %v2179_v34 }
  0x7e   :  { %1623 = vmatpush1.bf16.msra.mxu0 %v2186_v40 }
  0x7f   :  { %1625 = vmatprep.subr.bf16.mxu0 %v2190_v41 }
  0x82   :  { %1627 = vmatpush1.bf16.msra.mxu0 %v2198_v48 }
  0x83   :  { %1629 = vmatprep.subr.bf16.mxu0 %v2201_v49 }
  0x86   :  { %1631 = vmatpush1.bf16.msra.mxu0 %v2206_v54 }
  0x87   :  { %1633 = vmatprep.subr.bf16.mxu0 %v2209_v55 }
  0x8a   :  { %1635 = vmatpush1.bf16.msra.mxu0 %v2214_v60 }
  0x8b   :  { %1637 = vmatprep.subr.bf16.mxu0 %v2217_v61 }
  0x8e   :  { %1639 = vmatpush1.bf16.msra.mxu0 %v2222_v2 }
  0x8f   :  { %1641 = vmatprep.subr.bf16.mxu0 %v2225_v4 }
  0x92   :  { %1643 = vmatpush1.bf16.msra.mxu0 %v2230_v11 }
  0x93   :  { %1645 = vmatprep.subr.bf16.mxu0 %v2233_v12 }
  0x96   :  { %1647 = vmatpush1.bf16.msra.mxu0 %v2238_v21 }
  0x97   :  { %1649 = vmatprep.subr.bf16.mxu0 %v2241_v22 }
  0x9a   :  { %1651 = vmatpush1.bf16.msra.mxu0 %v2246_v30 }
  0x9b   :  { %1653 = vmatprep.subr.bf16.mxu0 %v2249_v31 }
  0x9e   :  { %1655 = vmatpush1.bf16.msra.mxu0 %v2254_v42 }
  0x9f   :  { %1657 = vmatprep.subr.bf16.mxu0 %v2257_v43 }
  0xa2   :  { %1659 = vmatpush1.bf16.msra.mxu0 %v2262_v51 }
  0xa3   :  { %1661 = vmatprep.subr.bf16.mxu0 %v2265_v52 }
  0xa6   :  { %1663 = vmatpush1.bf16.msra.mxu0 %v2273_v58 }
 0x13c   :  { %v180_v3 = vpop.f32.mrb[0].mxu0 }
 0x13d   :  { %vm185_vm0 = vcmp.ge.f32.partialorder %v180_v3, 0.01  ;;  %v182_v44 = vpop.f32.mrb[1].mxu0 }
 0x13e   :  { %v187_v62 = vsel %vm185_vm0, %v180_v3, 0.0  ;;  %vm186_vm1 = vcmp.ge.f32.partialorder %v182_v44, 0.01  ;;  %v771_v3 = vld [vmem:[#allocation2 + $0xb8] sm:$0xff] }
 0x13f   :  { %v189_v63 = vmul.f32 5.0, %v187_v62  ;;  %v188_v0 = vsel %vm186_vm1, %v182_v44, 0.0  ;;  %v2394_v62 = vpack.c.bf16 %v771_v3, %v769_v59 }
 0x140   :  { %v190_v1 = vmul.f32 5.0, %v188_v0  ;;  %v770_v0 = vld [vmem:[#allocation2 + $0xb0] sm:$0xff] }
 0x141   :  { %1990 = vtanh.f32 %v189_v63  ;;  %v768_v63 = vld [vmem:[#allocation2 + $0xa0] sm:$0xff] }
 0x142   :  { %1992 = vtanh.f32 %v190_v1  ;;  %v773_v1 = vld [vmem:[#allocation2 + $0xc8] sm:$0xff]  ;;  %v2397_v6 = vpack.c.bf16 %v770_v0, %v768_v63  ;;  %v795_v0 = vld [vmem:[#allocation2 + $0x178] sm:$0xff] }
 0x143   :  { %v2400_v9 = vpack.c.bf16 %v775_v5, %v773_v1  ;;  %v793_v63 = vld [vmem:[#allocation2 + $0x168] sm:$0xff]  ;;  %v792_v5 = vld [vmem:[#allocation2 + $0x160] sm:$0xff] }
 0x144   :  { %v2458_v1 = vpack.c.bf16 %v795_v0, %v793_v63 }
 0x14b   :  { %v1991_v10 = vpop.eup %1990 }
 0x14c   :  { %v1993_v16 = vpop.eup %1992 }
 0x14d   :  { %v195_v17 = vcombine.low %v1991_v10, %v1993_v16  ;;  %358 = vmatprep.mubr.f32.mxu1 %v1993_v16  ;;  %v774_v16 = vld [vmem:[#allocation2 + $0xd0] sm:$0xff] }
 0x14e   :  { %359 = vmatmul.mubr.f32.vlgmr.msra.gmra.mrb[0].mxu1 %v1991_v10  ;;  %v772_v10 = vld [vmem:[#allocation2 + $0xc0] sm:$0xff] }
 0x14f   :  { %v202_v18 = vrot.slane %v195_v17, %v2316_v15  ;;  %1667 = vmatpush1.bf16.msra.mxu1 %v2141_v7  ;;  %v282_v7 = vld [vmem:[#allocation5 + $0x1] ss:$8 sm:$0x3] }
 0x150   :  { %1669 = vmatprep.subr.bf16.mxu1 %v2143_v8  ;;  %v287_v8 = vrot.slane %v282_v7, %v2270_v57  ;;  %v777_v17 = vld [vmem:[#allocation2 + $0xe8] sm:$0xff] }
 0x151   :  { %v209_v24 = vrot.slane %v202_v18, %v2316_v15  ;;  %v779_v18 = vld [vmem:[#allocation2 + $0xf8] sm:$0xff] }
 0x153   :  { %215 = vst.msk [vmem:[#allocation7] ss:$8 sm:$0x3] %vm2321_vm2, %v209_v24  ;;  %1671 = vmatpush1.bf16.msra.mxu1 %v2148_v13  ;;  %v291_v13 = vrot.slane %v282_v7, %v2183_v39  ;;  %v2403_v24 = vpack.c.bf16 %v774_v16, %v772_v10  ;;  %v2406_v7 = vpack.c.bf16 %v779_v18, %v777_v17  ;;  %v794_v10 = vld [vmem:[#allocation2 + $0x170] sm:$0xff]  ;;  %v797_v17 = vld [vmem:[#allocation2 + $0x188] sm:$0xff]  ;;  %v799_v18 = vld [vmem:[#allocation2 + $0x198] sm:$0xff] }
 0x154   :  { %1673 = vmatprep.subr.bf16.mxu1 %v2152_v14  ;;  %v2460_v16 = vpack.c.bf16 %v794_v10, %v792_v5 }
 0x157   :  { %1675 = vmatpush1.bf16.msra.mxu1 %v2156_v19 }
 0x158   :  { %1677 = vmatprep.subr.bf16.mxu1 %v2160_v20 }
 0x15b   :  { %1679 = vmatpush1.bf16.msra.mxu1 %v2164_v26 }
 0x15c   :  { %1681 = vmatprep.subr.bf16.mxu1 %v2168_v27 }
 0x15f   :  { %1683 = vmatpush1.bf16.msra.mxu1 %v2175_v33 }
 0x160   :  { %1685 = vmatprep.subr.bf16.mxu1 %v2179_v34 }
 0x163   :  { %1687 = vmatpush1.bf16.msra.mxu1 %v2186_v40 }
 0x164   :  { %1689 = vmatprep.subr.bf16.mxu1 %v2190_v41 }
 0x167   :  { %1691 = vmatpush1.bf16.msra.mxu1 %v2198_v48 }
 0x168   :  { %1693 = vmatprep.subr.bf16.mxu1 %v2201_v49 }
 0x16b   :  { %1695 = vmatpush1.bf16.msra.mxu1 %v2206_v54  ;;  %v749_v54 = vld [vmem:[#allocation2 + $0x8] sm:$0xff] }
 0x16c   :  { %1697 = vmatprep.subr.bf16.mxu1 %v2209_v55  ;;  %v751_v55 = vld [vmem:[#allocation2 + $0x18] sm:$0xff] }
 0x16f   :  { %1699 = vmatpush1.bf16.msra.mxu1 %v2214_v60  ;;  %v748_v60 = vld [vmem:[#allocation2] sm:$0xff] }
 0x170   :  { %1701 = vmatprep.subr.bf16.mxu1 %v2217_v61  ;;  %v2364_v61 = vpack.c.bf16 %v751_v55, %v749_v54  ;;  %v791_v54 = vld [vmem:[#allocation2 + $0x158] sm:$0xff] }
 0x172   :  { %1729 = vmatprep.subr.bf16.mxu0 %v2364_v61 }
 0x173   :  { %1703 = vmatpush1.bf16.msra.mxu1 %v2222_v2  ;;  %v750_v2 = vld [vmem:[#allocation2 + $0x10] sm:$0xff] }
 0x174   :  { %1705 = vmatprep.subr.bf16.mxu1 %v2225_v4  ;;  %v753_v4 = vld [vmem:[#allocation2 + $0x28] sm:$0xff] }
 0x177   :  { %1707 = vmatpush1.bf16.msra.mxu1 %v2230_v11  ;;  %v755_v11 = vld [vmem:[#allocation2 + $0x38] sm:$0xff] }
 0x178   :  { %1709 = vmatprep.subr.bf16.mxu1 %v2233_v12  ;;  %v2366_v12 = vpack.c.bf16 %v750_v2, %v748_v60  ;;  %v788_v2 = vld [vmem:[#allocation2 + $0x140] sm:$0xff] }
 0x17b   :  { %1711 = vmatpush1.bf16.msra.mxu1 %v2238_v21  ;;  %v2368_v21 = vpack.c.bf16 %v755_v11, %v753_v4  ;;  %v790_v4 = vld [vmem:[#allocation2 + $0x150] sm:$0xff] }
 0x17c   :  { %1713 = vmatprep.subr.bf16.mxu1 %v2241_v22  ;;  %v752_v22 = vld [vmem:[#allocation2 + $0x20] sm:$0xff]  ;;  %v2427_v11 = vpack.c.bf16 %v790_v4, %v788_v2 }
 0x17d   :  { %v804_v4 = vld [vmem:[#allocation2 + $0x1c0] sm:$0xff] }
 0x17f   :  { %1715 = vmatpush1.bf16.msra.mxu1 %v2246_v30  ;;  %v759_v30 = vld [vmem:[#allocation2 + $0x58] sm:$0xff] }
 0x180   :  { %1717 = vmatprep.subr.bf16.mxu1 %v2249_v31  ;;  %v2373_v31 = vpack.c.bf16 %v754_v28, %v752_v22  ;;  %v2376_v35 = vpack.c.bf16 %v759_v30, %v757_v29  ;;  %v459_v22 = vld [vmem:[#allocation5 + $0x2] ss:$8 sm:$0x3] }
 0x181   :  { %v464_v28 = vrot.slane %v459_v22, %v2270_v57  ;;  %v468_v29 = vrot.slane %v459_v22, %v2183_v39  ;;  %v806_v22 = vld [vmem:[#allocation2 + $0x1d0] sm:$0xff] }
 0x183   :  { %1719 = vmatpush1.bf16.msra.mxu1 %v2254_v42  ;;  %v763_v42 = vld [vmem:[#allocation2 + $0x78] sm:$0xff] }
 0x184   :  { %1721 = vmatprep.subr.bf16.mxu1 %v2257_v43  ;;  %v2379_v43 = vpack.c.bf16 %v758_v37, %v756_v36  ;;  %v2382_v45 = vpack.c.bf16 %v763_v42, %v761_v38 }
 0x187   :  { %1723 = vmatpush1.bf16.msra.mxu1 %v2262_v51  ;;  %v767_v51 = vld [vmem:[#allocation2 + $0x98] sm:$0xff] }
 0x188   :  { %1725 = vmatprep.subr.bf16.mxu1 %v2265_v52  ;;  %v2385_v52 = vpack.c.bf16 %v762_v47, %v760_v46  ;;  %v2388_v53 = vpack.c.bf16 %v767_v51, %v765_v50 }
 0x18b   :  { %1727 = vmatpush1.bf16.msra.mxu1 %v2273_v58  ;;  %v766_v58 = vld [vmem:[#allocation2 + $0x90] sm:$0xff] }
 0x18c   :  { %1793 = vmatprep.subr.bf16.mxu1 %v2364_v61  ;;  %v2391_v44 = vpack.c.bf16 %v766_v58, %v764_v56 }
 0x221   :  { %v360_v14 = vpop.f32.mrb[0].mxu1 }
 0x222   :  { %v361_v19 = vadd.f32 %v360_v14, %v287_v8  ;;  %v362_v20 = vpop.f32.mrb[1].mxu1  ;;  %v776_v8 = vld [vmem:[#allocation2 + $0xe0] sm:$0xff]  ;;  %v781_v14 = vld [vmem:[#allocation2 + $0x108] sm:$0xff] }
 0x223   :  { %v363_v25 = vadd.f32 %v362_v20, %v291_v13  ;;  %v778_v13 = vld [vmem:[#allocation2 + $0xf0] sm:$0xff] }
 0x224   :  { %vm365_vm3 = vcmp.ge.f32.partialorder %v361_v19, 0.01  ;;  %v2409_v20 = vpack.c.bf16 %v778_v13, %v776_v8  ;;  %v2466_v8 = vpack.c.bf16 %v799_v18, %v797_v17  ;;  %v796_v13 = vld [vmem:[#allocation2 + $0x180] sm:$0xff] }
 0x225   :  { %v367_v26 = vsel %vm365_vm3, %v361_v19, 0.0  ;;  %vm366_vm4 = vcmp.ge.f32.partialorder %v363_v25, 0.01  ;;  %v783_v19 = vld [vmem:[#allocation2 + $0x118] sm:$0xff] }
 0x226   :  { %v369_v27 = vmul.f32 5.0, %v367_v26  ;;  %v368_v32 = vsel %vm366_vm4, %v363_v25, 0.0  ;;  %v2412_v25 = vpack.c.bf16 %v783_v19, %v781_v14  ;;  %v780_v26 = vld [vmem:[#allocation2 + $0x100] sm:$0xff]  ;;  %v798_v14 = vld [vmem:[#allocation2 + $0x190] sm:$0xff] }
 0x227   :  { %v370_v33 = vmul.f32 5.0, %v368_v32  ;;  %v785_v32 = vld [vmem:[#allocation2 + $0x128] sm:$0xff]  ;;  %v2468_v19 = vpack.c.bf16 %v798_v14, %v796_v13 }
 0x228   :  { %1994 = vtanh.f32 %v369_v27  ;;  %v782_v27 = vld [vmem:[#allocation2 + $0x110] sm:$0xff]  ;;  %v813_v14 = vld [vmem:[#allocation5 + $0x4] ss:$8 sm:$0x3] }
 0x229   :  { %1996 = vtanh.f32 %v370_v33  ;;  %v787_v33 = vld [vmem:[#allocation2 + $0x138] sm:$0xff] }
 0x232   :  { %v1995_v34 = vpop.eup %1994 }
 0x233   :  { %v1997_v40 = vpop.eup %1996 }
 0x234   :  { %v375_v41 = vcombine.low %v1995_v34, %v1997_v40  ;;  %535 = vmatprep.mubr.f32.mxu0 %v1997_v40  ;;  %v2418_v40 = vpack.c.bf16 %v787_v33, %v785_v32  ;;  %v800_v33 = vld [vmem:[#allocation2 + $0x1a0] sm:$0xff] }
 0x235   :  { %536 = vmatmul.mubr.f32.vlgmr.msra.gmra.mrb[2].mxu0 %v1995_v34  ;;  %v2415_v34 = vpack.c.bf16 %v782_v27, %v780_v26  ;;  %v801_v26 = vld [vmem:[#allocation2 + $0x1a8] sm:$0xff]  ;;  %v803_v27 = vld [vmem:[#allocation2 + $0x1b8] sm:$0xff] }
 0x236   :  { %v382_v48 = vrot.slane %v375_v41, %v2316_v15  ;;  %1731 = vmatpush1.bf16.msra.mxu0 %v2366_v12  ;;  %v784_v41 = vld [vmem:[#allocation2 + $0x120] sm:$0xff]  ;;  %v2474_v32 = vpack.c.bf16 %v803_v27, %v801_v26  ;;  %v818_v26 = vrot.slane %v813_v14, %v2270_v57  ;;  %v822_v27 = vrot.slane %v813_v14, %v2183_v39 }
 0x237   :  { %1733 = vmatprep.subr.bf16.mxu0 %v2368_v21 }
 0x238   :  { %v389_v49 = vrot.slane %v382_v48, %v2316_v15  ;;  %v786_v48 = vld [vmem:[#allocation2 + $0x130] sm:$0xff] }
 0x239   :  { %v2421_v55 = vpack.c.bf16 %v786_v48, %v784_v41  ;;  %v802_v41 = vld [vmem:[#allocation2 + $0x1b0] sm:$0xff] }
 0x23a   :  { %392 = vst.msk [vmem:[#allocation7 + $0x1] ss:$8 sm:$0x3] %vm2321_vm2, %v389_v49  ;;  %1735 = vmatpush1.bf16.msra.mxu0 %v2373_v31  ;;  %v789_v49 = vld [vmem:[#allocation2 + $0x148] sm:$0xff]  ;;  %v2476_v48 = vpack.c.bf16 %v802_v41, %v800_v33 }
 0x23b   :  { %1737 = vmatprep.subr.bf16.mxu0 %v2376_v35  ;;  %v2424_v60 = vpack.c.bf16 %v791_v54, %v789_v49  ;;  %v805_v49 = vld [vmem:[#allocation2 + $0x1c8] sm:$0xff]  ;;  %v807_v54 = vld [vmem:[#allocation2 + $0x1d8] sm:$0xff] }
 0x23c   :  { %v2482_v2 = vpack.c.bf16 %v807_v54, %v805_v49 }
 0x23e   :  { %1739 = vmatpush1.bf16.msra.mxu0 %v2379_v43 }
 0x23f   :  { %1741 = vmatprep.subr.bf16.mxu0 %v2382_v45 }
 0x242   :  { %1743 = vmatpush1.bf16.msra.mxu0 %v2385_v52 }
 0x243   :  { %1745 = vmatprep.subr.bf16.mxu0 %v2388_v53 }
 0x246   :  { %1747 = vmatpush1.bf16.msra.mxu0 %v2391_v44 }
 0x247   :  { %1749 = vmatprep.subr.bf16.mxu0 %v2394_v62 }
 0x24a   :  { %1751 = vmatpush1.bf16.msra.mxu0 %v2397_v6 }
 0x24b   :  { %1753 = vmatprep.subr.bf16.mxu0 %v2400_v9 }
 0x24e   :  { %1755 = vmatpush1.bf16.msra.mxu0 %v2403_v24 }
 0x24f   :  { %1757 = vmatprep.subr.bf16.mxu0 %v2406_v7 }
 0x252   :  { %1759 = vmatpush1.bf16.msra.mxu0 %v2409_v20 }
 0x253   :  { %1761 = vmatprep.subr.bf16.mxu0 %v2412_v25 }
 0x256   :  { %1763 = vmatpush1.bf16.msra.mxu0 %v2415_v34 }
 0x257   :  { %1765 = vmatprep.subr.bf16.mxu0 %v2418_v40 }
 0x25a   :  { %1767 = vmatpush1.bf16.msra.mxu0 %v2421_v55 }
 0x25b   :  { %1769 = vmatprep.subr.bf16.mxu0 %v2424_v60 }
 0x25e   :  { %1771 = vmatpush1.bf16.msra.mxu0 %v2427_v11 }
 0x25f   :  { %1773 = vmatprep.subr.bf16.mxu0 %v2458_v1 }
 0x262   :  { %1775 = vmatpush1.bf16.msra.mxu0 %v2460_v16 }
 0x263   :  { %1777 = vmatprep.subr.bf16.mxu0 %v2466_v8 }
 0x266   :  { %1779 = vmatpush1.bf16.msra.mxu0 %v2468_v19 }
 0x267   :  { %1781 = vmatprep.subr.bf16.mxu0 %v2474_v32 }
 0x26a   :  { %1783 = vmatpush1.bf16.msra.mxu0 %v2476_v48 }
 0x26b   :  { %1785 = vmatprep.subr.bf16.mxu0 %v2482_v2 }
 0x308   :  { %v537_v30 = vpop.f32.mrb[2].mxu0 }
 0x309   :  { %v538_v36 = vadd.f32 %v537_v30, %v464_v28  ;;  %v539_v37 = vpop.f32.mrb[3].mxu0  ;;  %v2484_v28 = vpack.c.bf16 %v806_v22, %v804_v4  ;;  %v811_v30 = vld [vmem:[#allocation2 + $0x1f8] sm:$0xff] }
 0x30a   :  { %v540_v38 = vadd.f32 %v539_v37, %v468_v29  ;;  %v809_v29 = vld [vmem:[#allocation2 + $0x1e8] sm:$0xff]  ;;  %v808_v37 = vld [vmem:[#allocation2 + $0x1e0] sm:$0xff] }
 0x30b   :  { %vm542_vm5 = vcmp.ge.f32.partialorder %v538_v36, 0.01  ;;  %1787 = vmatpush1.bf16.msra.mxu0 %v2484_v28 }
 0x30c   :  { %v544_v42 = vsel %vm542_vm5, %v538_v36, 0.0  ;;  %vm543_vm6 = vcmp.ge.f32.partialorder %v540_v38, 0.01  ;;  %v2490_v36 = vpack.c.bf16 %v811_v30, %v809_v29 }
 0x30d   :  { %v546_v46 = vmul.f32 5.0, %v544_v42  ;;  %v545_v47 = vsel %vm543_vm6, %v540_v38, 0.0  ;;  %v810_v38 = vld [vmem:[#allocation2 + $0x1f0] sm:$0xff] }
 0x30e   :  { %v547_v50 = vmul.f32 5.0, %v545_v47  ;;  %v2492_v42 = vpack.c.bf16 %v810_v38, %v808_v37  ;;  %1789 = vmatprep.subr.bf16.mxu0 %v2490_v36 }
 0x30f   :  { %1998 = vtanh.f32 %v546_v46  ;;  %v636_v46 = vld [vmem:[#allocation5 + $0x3] ss:$8 sm:$0x3] }
 0x310   :  { %2000 = vtanh.f32 %v547_v50  ;;  %1791 = vmatpush1.bf16.msra.mxu0 %v2492_v42  ;;  %v641_v47 = vrot.slane %v636_v46, %v2270_v57  ;;  %v645_v50 = vrot.slane %v636_v46, %v2183_v39 }
 0x311   :  { %1857 = vmatprep.subr.bf16.mxu0 %v2364_v61 }
 0x319   :  { %v1999_v51 = vpop.eup %1998 }
 0x31a   :  { %v2001_v56 = vpop.eup %2000 }
 0x31b   :  { %v552_v58 = vcombine.low %v1999_v51, %v2001_v56  ;;  %712 = vmatprep.mubr.f32.mxu1 %v2001_v56 }
 0x31c   :  { %713 = vmatmul.mubr.f32.vlgmr.msra.gmra.mrb[2].mxu1 %v1999_v51 }
 0x31d   :  { %v559_v59 = vrot.slane %v552_v58, %v2316_v15  ;;  %1795 = vmatpush1.bf16.msra.mxu1 %v2366_v12 }
 0x31e   :  { %1797 = vmatprep.subr.bf16.mxu1 %v2368_v21 }
 0x31f   :  { %v566_v3 = vrot.slane %v559_v59, %v2316_v15 }
 0x321   :  { %569 = vst.msk [vmem:[#allocation7 + $0x2] ss:$8 sm:$0x3] %vm2321_vm2, %v566_v3  ;;  %1799 = vmatpush1.bf16.msra.mxu1 %v2373_v31 }
 0x322   :  { %1801 = vmatprep.subr.bf16.mxu1 %v2376_v35 }
 0x325   :  { %1803 = vmatpush1.bf16.msra.mxu1 %v2379_v43 }
 0x326   :  { %1805 = vmatprep.subr.bf16.mxu1 %v2382_v45 }
 0x329   :  { %1807 = vmatpush1.bf16.msra.mxu1 %v2385_v52 }
 0x32a   :  { %1809 = vmatprep.subr.bf16.mxu1 %v2388_v53 }
 0x32d   :  { %1811 = vmatpush1.bf16.msra.mxu1 %v2391_v44 }
 0x32e   :  { %1813 = vmatprep.subr.bf16.mxu1 %v2394_v62 }
 0x331   :  { %1815 = vmatpush1.bf16.msra.mxu1 %v2397_v6 }
 0x332   :  { %1817 = vmatprep.subr.bf16.mxu1 %v2400_v9 }
 0x335   :  { %1819 = vmatpush1.bf16.msra.mxu1 %v2403_v24 }
 0x336   :  { %1821 = vmatprep.subr.bf16.mxu1 %v2406_v7 }
 0x339   :  { %1823 = vmatpush1.bf16.msra.mxu1 %v2409_v20 }
 0x33a   :  { %1825 = vmatprep.subr.bf16.mxu1 %v2412_v25 }
 0x33d   :  { %1827 = vmatpush1.bf16.msra.mxu1 %v2415_v34 }
 0x33e   :  { %1829 = vmatprep.subr.bf16.mxu1 %v2418_v40 }
 0x341   :  { %1831 = vmatpush1.bf16.msra.mxu1 %v2421_v55 }
 0x342   :  { %1833 = vmatprep.subr.bf16.mxu1 %v2424_v60 }
 0x345   :  { %1835 = vmatpush1.bf16.msra.mxu1 %v2427_v11 }
 0x346   :  { %1837 = vmatprep.subr.bf16.mxu1 %v2458_v1 }
 0x349   :  { %1839 = vmatpush1.bf16.msra.mxu1 %v2460_v16 }
 0x34a   :  { %1841 = vmatprep.subr.bf16.mxu1 %v2466_v8 }
 0x34d   :  { %1843 = vmatpush1.bf16.msra.mxu1 %v2468_v19 }
 0x34e   :  { %1845 = vmatprep.subr.bf16.mxu1 %v2474_v32 }
 0x351   :  { %1847 = vmatpush1.bf16.msra.mxu1 %v2476_v48 }
 0x352   :  { %1849 = vmatprep.subr.bf16.mxu1 %v2482_v2 }
 0x355   :  { %1851 = vmatpush1.bf16.msra.mxu1 %v2484_v28 }
 0x356   :  { %1853 = vmatprep.subr.bf16.mxu1 %v2490_v36 }
 0x359   :  { %1855 = vmatpush1.bf16.msra.mxu1 %v2492_v42 }
 0x35a   :  { %1921 = vmatprep.subr.bf16.mxu1 %v2364_v61 }
 0x3ef   :  { %v714_v51 = vpop.f32.mrb[2].mxu1 }
 0x3f0   :  { %v715_v56 = vadd.f32 %v714_v51, %v641_v47  ;;  %v716_v58 = vpop.f32.mrb[3].mxu1 }
 0x3f1   :  { %v717_v59 = vadd.f32 %v716_v58, %v645_v50 }
 0x3f2   :  { %vm719_vm7 = vcmp.ge.f32.partialorder %v715_v56, 0.01 }
 0x3f3   :  { %v721_v3 = vsel %vm719_vm7, %v715_v56, 0.0  ;;  %vm720_vm8 = vcmp.ge.f32.partialorder %v717_v59, 0.01  ;;  %v1344_v56 = vld [vmem:[#allocation5 + $0x7] ss:$8 sm:$0x3] }
 0x3f4   :  { %v723_v63 = vmul.f32 5.0, %v721_v3  ;;  %v722_v0 = vsel %vm720_vm8, %v717_v59, 0.0  ;;  %v1349_v58 = vrot.slane %v1344_v56, %v2270_v57  ;;  %v1353_v59 = vrot.slane %v1344_v56, %v2183_v39 }
 0x3f5   :  { %v724_v5 = vmul.f32 5.0, %v722_v0 }
 0x3f6   :  { %2002 = vtanh.f32 %v723_v63 }
 0x3f7   :  { %2004 = vtanh.f32 %v724_v5 }
 0x400   :  { %v2003_v10 = vpop.eup %2002 }
 0x401   :  { %v2005_v17 = vpop.eup %2004 }
 0x402   :  { %v729_v61 = vcombine.low %v2003_v10, %v2005_v17  ;;  %889 = vmatprep.mubr.f32.mxu0 %v2005_v17 }
 0x403   :  { %890 = vmatmul.mubr.f32.vlgmr.msra.gmra.mrb[4].mxu0 %v2003_v10 }
 0x404   :  { %v736_v18 = vrot.slane %v729_v61, %v2316_v15  ;;  %1859 = vmatpush1.bf16.msra.mxu0 %v2366_v12 }
 0x405   :  { %1861 = vmatprep.subr.bf16.mxu0 %v2368_v21 }
 0x406   :  { %v743_v13 = vrot.slane %v736_v18, %v2316_v15 }
 0x408   :  { %746 = vst.msk [vmem:[#allocation7 + $0x3] ss:$8 sm:$0x3] %vm2321_vm2, %v743_v13  ;;  %1863 = vmatpush1.bf16.msra.mxu0 %v2373_v31 }
 0x409   :  { %1865 = vmatprep.subr.bf16.mxu0 %v2376_v35 }
 0x40c   :  { %1867 = vmatpush1.bf16.msra.mxu0 %v2379_v43 }
 0x40d   :  { %1869 = vmatprep.subr.bf16.mxu0 %v2382_v45 }
 0x410   :  { %1871 = vmatpush1.bf16.msra.mxu0 %v2385_v52 }
 0x411   :  { %1873 = vmatprep.subr.bf16.mxu0 %v2388_v53 }
 0x414   :  { %1875 = vmatpush1.bf16.msra.mxu0 %v2391_v44 }
 0x415   :  { %1877 = vmatprep.subr.bf16.mxu0 %v2394_v62 }
 0x418   :  { %1879 = vmatpush1.bf16.msra.mxu0 %v2397_v6 }
 0x419   :  { %1881 = vmatprep.subr.bf16.mxu0 %v2400_v9 }
 0x41c   :  { %1883 = vmatpush1.bf16.msra.mxu0 %v2403_v24 }
 0x41d   :  { %1885 = vmatprep.subr.bf16.mxu0 %v2406_v7 }
 0x420   :  { %1887 = vmatpush1.bf16.msra.mxu0 %v2409_v20 }
 0x421   :  { %1889 = vmatprep.subr.bf16.mxu0 %v2412_v25 }
 0x424   :  { %1891 = vmatpush1.bf16.msra.mxu0 %v2415_v34 }
 0x425   :  { %1893 = vmatprep.subr.bf16.mxu0 %v2418_v40 }
 0x428   :  { %1895 = vmatpush1.bf16.msra.mxu0 %v2421_v55 }
 0x429   :  { %1897 = vmatprep.subr.bf16.mxu0 %v2424_v60 }
 0x42c   :  { %1899 = vmatpush1.bf16.msra.mxu0 %v2427_v11 }
 0x42d   :  { %1901 = vmatprep.subr.bf16.mxu0 %v2458_v1 }
 0x430   :  { %1903 = vmatpush1.bf16.msra.mxu0 %v2460_v16 }
 0x431   :  { %1905 = vmatprep.subr.bf16.mxu0 %v2466_v8 }
 0x434   :  { %1907 = vmatpush1.bf16.msra.mxu0 %v2468_v19 }
 0x435   :  { %1909 = vmatprep.subr.bf16.mxu0 %v2474_v32 }
 0x438   :  { %1911 = vmatpush1.bf16.msra.mxu0 %v2476_v48 }
 0x439   :  { %1913 = vmatprep.subr.bf16.mxu0 %v2482_v2 }
 0x43c   :  { %1915 = vmatpush1.bf16.msra.mxu0 %v2484_v28 }
 0x43d   :  { %1917 = vmatprep.subr.bf16.mxu0 %v2490_v36 }
 0x440   :  { %1919 = vmatpush1.bf16.msra.mxu0 %v2492_v42 }
 0x4d6   :  { %v891_v33 = vpop.f32.mrb[4].mxu0 }
 0x4d7   :  { %v892_v41 = vadd.f32 %v891_v33, %v818_v26  ;;  %v893_v49 = vpop.f32.mrb[5].mxu0 }
 0x4d8   :  { %v894_v54 = vadd.f32 %v893_v49, %v822_v27 }
 0x4d9   :  { %vm896_vm9 = vcmp.ge.f32.partialorder %v892_v41, 0.01 }
 0x4da   :  { %v898_v4 = vsel %vm896_vm9, %v892_v41, 0.0  ;;  %vm897_vm10 = vcmp.ge.f32.partialorder %v894_v54, 0.01 }
 0x4db   :  { %v900_v22 = vmul.f32 5.0, %v898_v4  ;;  %v899_v29 = vsel %vm897_vm10, %v894_v54, 0.0 }
 0x4dc   :  { %v901_v30 = vmul.f32 5.0, %v899_v29 }
 0x4dd   :  { %2006 = vtanh.f32 %v900_v22 }
 0x4de   :  { %2008 = vtanh.f32 %v901_v30 }
 0x4e7   :  { %v2007_v37 = vpop.eup %2006 }
 0x4e8   :  { %v2009_v38 = vpop.eup %2008 }
 0x4e9   :  { %v906_v46 = vcombine.low %v2007_v37, %v2009_v38  ;;  %1066 = vmatprep.mubr.f32.mxu1 %v2009_v38 }
 0x4ea   :  { %1067 = vmatmul.mubr.f32.vlgmr.msra.gmra.mrb[4].mxu1 %v2007_v37 }
 0x4eb   :  { %v913_v47 = vrot.slane %v906_v46, %v2316_v15  ;;  %1923 = vmatpush1.bf16.msra.mxu1 %v2366_v12  ;;  %v990_v12 = vld [vmem:[#allocation5 + $0x5] ss:$8 sm:$0x3] }
 0x4ec   :  { %1925 = vmatprep.subr.bf16.mxu1 %v2368_v21  ;;  %v995_v21 = vrot.slane %v990_v12, %v2270_v57 }
 0x4ed   :  { %v920_v50 = vrot.slane %v913_v47, %v2316_v15 }
 0x4ef   :  { %923 = vst.msk [vmem:[#allocation7 + $0x4] ss:$8 sm:$0x3] %vm2321_vm2, %v920_v50  ;;  %1927 = vmatpush1.bf16.msra.mxu1 %v2373_v31  ;;  %v999_v31 = vrot.slane %v990_v12, %v2183_v39 }
 0x4f0   :  { %1929 = vmatprep.subr.bf16.mxu1 %v2376_v35 }
 0x4f3   :  { %1931 = vmatpush1.bf16.msra.mxu1 %v2379_v43 }
 0x4f4   :  { %1933 = vmatprep.subr.bf16.mxu1 %v2382_v45 }
 0x4f7   :  { %1935 = vmatpush1.bf16.msra.mxu1 %v2385_v52 }
 0x4f8   :  { %1937 = vmatprep.subr.bf16.mxu1 %v2388_v53 }
 0x4fb   :  { %1939 = vmatpush1.bf16.msra.mxu1 %v2391_v44 }
 0x4fc   :  { %1941 = vmatprep.subr.bf16.mxu1 %v2394_v62 }
 0x4ff   :  { %1943 = vmatpush1.bf16.msra.mxu1 %v2397_v6 }
 0x500   :  { %1945 = vmatprep.subr.bf16.mxu1 %v2400_v9 }
 0x503   :  { %1947 = vmatpush1.bf16.msra.mxu1 %v2403_v24 }
 0x504   :  { %1949 = vmatprep.subr.bf16.mxu1 %v2406_v7 }
 0x507   :  { %1951 = vmatpush1.bf16.msra.mxu1 %v2409_v20 }
 0x508   :  { %1953 = vmatprep.subr.bf16.mxu1 %v2412_v25 }
 0x50b   :  { %1955 = vmatpush1.bf16.msra.mxu1 %v2415_v34  ;;  %v1167_v34 = vld [vmem:[#allocation5 + $0x6] ss:$8 sm:$0x3] }
 0x50c   :  { %1957 = vmatprep.subr.bf16.mxu1 %v2418_v40  ;;  %v1172_v40 = vrot.slane %v1167_v34, %v2270_v57 }
 0x50f   :  { %1959 = vmatpush1.bf16.msra.mxu1 %v2421_v55  ;;  %v1176_v55 = vrot.slane %v1167_v34, %v2183_v39 }
 0x510   :  { %1961 = vmatprep.subr.bf16.mxu1 %v2424_v60 }
 0x513   :  { %1963 = vmatpush1.bf16.msra.mxu1 %v2427_v11 }
 0x514   :  { %1965 = vmatprep.subr.bf16.mxu1 %v2458_v1 }
 0x517   :  { %1967 = vmatpush1.bf16.msra.mxu1 %v2460_v16 }
 0x518   :  { %1969 = vmatprep.subr.bf16.mxu1 %v2466_v8 }
 0x51b   :  { %1971 = vmatpush1.bf16.msra.mxu1 %v2468_v19 }
 0x51c   :  { %1973 = vmatprep.subr.bf16.mxu1 %v2474_v32 }
 0x51f   :  { %1975 = vmatpush1.bf16.msra.mxu1 %v2476_v48 }
 0x520   :  { %1977 = vmatprep.subr.bf16.mxu1 %v2482_v2 }
 0x523   :  { %1979 = vmatpush1.bf16.msra.mxu1 %v2484_v28 }
 0x524   :  { %1981 = vmatprep.subr.bf16.mxu1 %v2490_v36 }
 0x527   :  { %1983 = vmatpush1.bf16.msra.mxu1 %v2492_v42 }
 0x5bd   :  { %v1068_v35 = vpop.f32.mrb[4].mxu1 }
 0x5be   :  { %v1069_v43 = vadd.f32 %v1068_v35, %v995_v21  ;;  %v1070_v45 = vpop.f32.mrb[5].mxu1 }
 0x5bf   :  { %v1071_v52 = vadd.f32 %v1070_v45, %v999_v31 }
 0x5c0   :  { %vm1073_vm11 = vcmp.ge.f32.partialorder %v1069_v43, 0.01 }
 0x5c1   :  { %v1075_v53 = vsel %vm1073_vm11, %v1069_v43, 0.0  ;;  %vm1074_vm12 = vcmp.ge.f32.partialorder %v1071_v52, 0.01 }
 0x5c2   :  { %v1077_v44 = vmul.f32 5.0, %v1075_v53  ;;  %v1076_v62 = vsel %vm1074_vm12, %v1071_v52, 0.0 }
 0x5c3   :  { %v1078_v6 = vmul.f32 5.0, %v1076_v62 }
 0x5c4   :  { %2010 = vtanh.f32 %v1077_v44 }
 0x5c5   :  { %2012 = vtanh.f32 %v1078_v6 }
 0x5ce   :  { %v2011_v9 = vpop.eup %2010 }
 0x5cf   :  { %v2013_v24 = vpop.eup %2012 }
 0x5d0   :  { %v1083_v7 = vcombine.low %v2011_v9, %v2013_v24  ;;  %1243 = vmatprep.mubr.f32.mxu0 %v2013_v24 }
 0x5d1   :  { %1244 = vmatmul.mubr.f32.vlgmr.msra.gmra.mrb[6].mxu0 %v2011_v9 }
 0x5d2   :  { %v1090_v20 = vrot.slane %v1083_v7, %v2316_v15 }
 0x5d4   :  { %v1097_v25 = vrot.slane %v1090_v20, %v2316_v15 }
 0x5d6   :  { %1100 = vst.msk [vmem:[#allocation7 + $0x5] ss:$8 sm:$0x3] %vm2321_vm2, %v1097_v25 }
 0x6a4   :  { %v1245_v60 = vpop.f32.mrb[6].mxu0 }
 0x6a5   :  { %v1246_v11 = vadd.f32 %v1245_v60, %v1172_v40  ;;  %v1247_v1 = vpop.f32.mrb[7].mxu0 }
 0x6a6   :  { %v1248_v16 = vadd.f32 %v1247_v1, %v1176_v55 }
 0x6a7   :  { %vm1250_vm13 = vcmp.ge.f32.partialorder %v1246_v11, 0.01 }
 0x6a8   :  { %v1252_v8 = vsel %vm1250_vm13, %v1246_v11, 0.0  ;;  %vm1251_vm14 = vcmp.ge.f32.partialorder %v1248_v16, 0.01 }
 0x6a9   :  { %v1254_v19 = vmul.f32 5.0, %v1252_v8  ;;  %v1253_v32 = vsel %vm1251_vm14, %v1248_v16, 0.0 }
 0x6aa   :  { %v1255_v48 = vmul.f32 5.0, %v1253_v32 }
 0x6ab   :  { %2014 = vtanh.f32 %v1254_v19 }
 0x6ac   :  { %2016 = vtanh.f32 %v1255_v48 }
 0x6b5   :  { %v2015_v2 = vpop.eup %2014 }
 0x6b6   :  { %v2017_v28 = vpop.eup %2016 }
 0x6b7   :  { %v1260_v36 = vcombine.low %v2015_v2, %v2017_v28  ;;  %1420 = vmatprep.mubr.f32.mxu1 %v2017_v28 }
 0x6b8   :  { %1421 = vmatmul.mubr.f32.vlgmr.msra.gmra.mrb[6].mxu1 %v2015_v2 }
 0x6b9   :  { %v1267_v42 = vrot.slane %v1260_v36, %v2316_v15 }
 0x6bb   :  { %v1274_v51 = vrot.slane %v1267_v42, %v2316_v15 }
 0x6bd   :  { %1277 = vst.msk [vmem:[#allocation7 + $0x6] ss:$8 sm:$0x3] %vm2321_vm2, %v1274_v51 }
 0x78b   :  { %v1422_v3 = vpop.f32.mrb[6].mxu1 }
 0x78c   :  { %v1423_v63 = vadd.f32 %v1422_v3, %v1349_v58  ;;  %v1424_v0 = vpop.f32.mrb[7].mxu1 }
 0x78d   :  { %v1425_v5 = vadd.f32 %v1424_v0, %v1353_v59 }
 0x78e   :  { %vm1427_vm15 = vcmp.ge.f32.partialorder %v1423_v63, 0.01 }
 0x78f   :  { %v1429_v10 = vsel %vm1427_vm15, %v1423_v63, 0.0  ;;  %vm1428_vm0 = vcmp.ge.f32.partialorder %v1425_v5, 0.01 }
 0x790   :  { %v1431_v17 = vmul.f32 5.0, %v1429_v10  ;;  %v1430_v61 = vsel %vm1428_vm0, %v1425_v5, 0.0 }
 0x791   :  { %v1432_v18 = vmul.f32 5.0, %v1430_v61 }
 0x792   :  { %2018 = vtanh.f32 %v1431_v17 }
 0x793   :  { %2020 = vtanh.f32 %v1432_v18 }
 0x79c   :  { %v2019_v13 = vpop.eup %2018 }
 0x79d   :  { %v2021_v14 = vpop.eup %2020 }
 0x79e   :  { %v1437_v26 = vcombine.low %v2019_v13, %v2021_v14 }
 0x7a0   :  { %v1444_v57 = vrot.slane %v1437_v26, %v2316_v15 }
 0x7a2   :  { %v1451_v39 = vrot.slane %v1444_v57, %v2316_v15 }
 0x7a4   :  { %1454 = vst.msk [vmem:[#allocation7 + $0x7] ss:$8 sm:$0x3] %vm2321_vm2, %v1451_v39 }
 0x7a5   :  { %2077 = shalt.err (!%p2074_p6)
}
 0x7a6   :  { %s2078_s10 = scalar_lea.hbm %s2606_s2, 256 }
 0x7a7   :  { %p2079_p7 = scmp.ne.s32.totalorder %s2606_s2, %s2078_s10  ;;  %p2082_p8 = scmp.lt.u32.totalorder %s2078_s10, %s2606_s2 }
 0x7a9   :  { %p2084_p9 = pnand %p2082_p8, %p2079_p7 }
 0x7ab   :  { %2087 = shalt.err (!%p2084_p9)
}
 0x7ac   :  { %1465 = dma.vmem_to_hbm [thread:$0]  %s1463_s6, 256, %s2606_s2, [#allocation4]  }
 0x7ad   :  { %2092 = dma.done.wait [#allocation4], 256  }
 0x7ae   :  { %2093 = vsyncadd [#allocation4], 4294967040 }
 0x7af   :  { %1469 = vsyncpa [#allocation3], 1 }
 0x7b0   :  { %1470 = vsyncpa [#allocation6], 1 }
 0x7b1   :  { %1471 = vsyncpa [#allocation4], 1 }

</bundles_post_ra>
